<compile_context>
chip_gen: v6e
topology: v6e:2x2x1
jax: 0.10.0
libtpu: 0.0.40
codegen_flags: <defaults>
</compile_context>

<pallas_src>
import functools
import math

import jax
import jax.numpy as jnp
from jax import lax
from jax.experimental import pallas as pl
from jax.experimental.pallas import tpu as pltpu


def _flash_attn_kernel(q_ref, k_ref, v_ref, o_ref, m_sc, l_sc, acc_sc, *, scale):
    kv = pl.program_id(2)

    @pl.when(kv == 0)
    def _init():
        m_sc[...] = jnp.full_like(m_sc, -jnp.inf)
        l_sc[...] = jnp.zeros_like(l_sc)
        acc_sc[...] = jnp.zeros_like(acc_sc)

    # Fold 1/sqrt(n_state) into q: tq*E multiplies instead of tq*tk.
    q = q_ref[0] * scale          # (tq, E), stays in the input dtype
    k = k_ref[0]                  # (tk, E)
    v = v_ref[0]                  # (tk, E)

    # Scores: contract the feature axis of both operands directly (transposed
    # RHS contraction — no XLU transpose), accumulate in f32 on the MXU.
    s = lax.dot_general(
        q, k,
        dimension_numbers=(((1,), (1,)), ((), ())),
        preferred_element_type=jnp.float32,
    )                             # (tq, tk) f32

    # Online (flash) softmax update.
    m_prev = m_sc[...]                                        # (tq, 1)
    m_new = jnp.maximum(m_prev, jnp.max(s, axis=-1, keepdims=True))
    alpha = jnp.exp(m_prev - m_new)                           # (tq, 1)
    p = jnp.exp(s - m_new)                                    # (tq, tk) f32
    l_sc[...] = alpha * l_sc[...] + jnp.sum(p, axis=-1, keepdims=True)
    acc_sc[...] = alpha * acc_sc[...] + lax.dot_general(
        p.astype(v.dtype), v,
        dimension_numbers=(((1,), (0,)), ((), ())),
        preferred_element_type=jnp.float32,
    )
    m_sc[...] = m_new

    @pl.when(kv == pl.num_programs(2) - 1)
    def _finalize():
        l = l_sc[...]
        inv_l = pl.reciprocal(l, approx=True)   # EUP slot, off the VALU
        inv_l = inv_l * (2.0 - l * inv_l)       # one NR step on (tq,1) → near-exact
        o_ref[0] = (acc_sc[...] * inv_l).astype(o_ref.dtype)


def _tile_size(total, cap):
    """Largest MXU-friendly divisor of `total` that is <= cap (falls back to total)."""
    if total <= cap:
        return total
    for cand in (512, 384, 256, 128, 64, 32, 16, 8):
        if cand <= cap and total % cand == 0:
            return cand
    return total


def _attention_core(q, k, v, heads, tq=None, tk=None):
    B, T, E = q.shape
    n_state = E // heads
    scale = 1.0 / math.sqrt(n_state)

    # Flash tiles: caps chosen so double-buffered q/k/v/o blocks + f32
    # accumulators stay well under the 48 MiB VMEM limit (and v7x's 64 MiB
    # physical VMEM) even for large E, while amortizing per-step overhead.
    if tq is None:
        tq = _tile_size(T, 256)
    if tk is None:
        tk = _tile_size(T, 512)
    assert T % tq == 0 and T % tk == 0, (T, tq, tk)
    grid = (B, T // tq, T // tk)

    dsize = jnp.dtype(q.dtype).itemsize
    cost = pl.CostEstimate(
        flops=4 * B * T * T * E,
        transcendentals=B * T * T,
        bytes_accessed=4 * B * T * E * dsize,
    )

    kernel = functools.partial(_flash_attn_kernel, scale=scale)

    return pl.pallas_call(
        kernel,
        out_shape=jax.ShapeDtypeStruct((B, T, E), q.dtype),
        grid_spec=pltpu.PrefetchScalarGridSpec(
            num_scalar_prefetch=0,
            grid=grid,
            in_specs=[
                pl.BlockSpec((1, tq, E), lambda b, qi, ki: (b, qi, 0)),
                pl.BlockSpec((1, tk, E), lambda b, qi, ki: (b, ki, 0)),
                pl.BlockSpec((1, tk, E), lambda b, qi, ki: (b, ki, 0)),
            ],
            out_specs=pl.BlockSpec((1, tq, E), lambda b, qi, ki: (b, qi, 0)),
            scratch_shapes=[
                pltpu.VMEM((tq, 1), jnp.float32),   # running row max m
                pltpu.VMEM((tq, 1), jnp.float32),   # running row sum l
                pltpu.VMEM((tq, E), jnp.float32),   # un-normalized output acc
            ],
        ),
        compiler_params=pltpu.CompilerParams(
            dimension_semantics=("parallel", "parallel", "arbitrary"),
            vmem_limit_bytes=48 * 1024 * 1024,
        ),
        cost_estimate=cost,
    )(q, k, v)


def _strided_transpose(x, n_ctx, local_attn_ctx, blocksize):
    bT_ctx = n_ctx // local_attn_ctx
    assert bT_ctx % blocksize == 0, f"{bT_ctx}, {blocksize}"
    n, t, embd = x.shape
    x = jnp.reshape(x, (n, bT_ctx, local_attn_ctx, embd))
    x = jnp.transpose(x, (0, 2, 1, 3))
    x = jnp.reshape(x, (n, t, embd))
    return x


def sparse_attention(q, k, v, heads, attn_mode, local_attn_ctx=None, blocksize=32,
                     tq=None, tk=None):
    """JAX/Pallas equivalent of SparseAttention.forward."""
    n_ctx = q.shape[1]
    if attn_mode == "strided":
        # Intended behavior of the (broken) torch strided path: permute (0,2,1,3).
        q = _strided_transpose(q, n_ctx, local_attn_ctx, blocksize)
        k = _strided_transpose(k, n_ctx, local_attn_ctx, blocksize)
        v = _strided_transpose(v, n_ctx, local_attn_ctx, blocksize)

    a = _attention_core(q, k, v, heads, tq=tq, tk=tk)

    if attn_mode == "strided":
        n, t, embd = a.shape
        bT_ctx = n_ctx // local_attn_ctx
        a = jnp.reshape(a, (n, local_attn_ctx, bT_ctx, embd))
        a = jnp.transpose(a, (0, 2, 1, 3))
        a = jnp.reshape(a, (n, t, embd))
    return a


def _reference(q, k, v, heads, attn_mode="all", local_attn_ctx=None, blocksize=32):
    n_ctx = q.shape[1]
    if attn_mode == "strided":
        q = _strided_transpose(q, n_ctx, local_attn_ctx, blocksize)
        k = _strided_transpose(k, n_ctx, local_attn_ctx, blocksize)
        v = _strided_transpose(v, n_ctx, local_attn_ctx, blocksize)
    n_state = q.shape[-1] // heads
    scale = 1.0 / math.sqrt(n_state)
    w = jnp.einsum("bqe,bke->bqk", q.astype(jnp.float32), k.astype(jnp.float32))
    w = jax.nn.softmax(w * scale, axis=-1)
    a = jnp.einsum("bqk,bke->bqe", w, v.astype(jnp.float32)).astype(q.dtype)
    if attn_mode == "strided":
        n, t, embd = a.shape
        bT_ctx = n_ctx // local_attn_ctx
        a = jnp.reshape(a, (n, local_attn_ctx, bT_ctx, embd))
        a = jnp.transpose(a, (0, 2, 1, 3))
        a = jnp.reshape(a, (n, t, embd))
    return a


if __name__ == "__main__":
    # SparseAttention has no learned parameters; only hyperparameters.
    heads = 4

    B, T, E = 2, 64, 32
    key = jax.random.PRNGKey(0)
    kq, kk, kv = jax.random.split(key, 3)
    q = jax.random.normal(kq, (B, T, E), dtype=jnp.float32)
    k = jax.random.normal(kk, (B, T, E), dtype=jnp.float32)
    v = jax.random.normal(kv, (B, T, E), dtype=jnp.float32)

    # 1) 'all' mode, default (single-tile) configuration.
    out = sparse_attention(q, k, v, heads, "all")
    out = jax.block_until_ready(out)
    ref = _reference(q, k, v, heads, "all")
    assert out.shape == (B, T, E)
    assert jnp.allclose(out, ref, atol=2e-4, rtol=2e-4), "mismatch vs reference (all)"

    # 2) 'all' mode with forced small tiles to exercise the multi-step
    #    online-softmax / accumulator path (grid = (2, 2, 4)).
    out_tiled = sparse_attention(q, k, v, heads, "all", tq=32, tk=16)
    out_tiled = jax.block_until_ready(out_tiled)
    assert jnp.allclose(out_tiled, ref, atol=2e-4, rtol=2e-4), \
        "mismatch vs reference (all, tiled)"

    # 3) 'strided' mode (intended permutation semantics) just to exercise the glue.
    out_str = sparse_attention(q, k, v, heads, "strided", local_attn_ctx=2, blocksize=32)
    out_str = jax.block_until_ready(out_str)
    ref_str = _reference(q, k, v, heads, "strided", local_attn_ctx=2, blocksize=32)
    assert jnp.allclose(out_str, ref_str, atol=2e-4, rtol=2e-4), \
        "mismatch vs reference (strided)"

    print("KERNEL_OK")
</pallas_src>

<mosaic_0001>
module attributes {stable_mosaic.version = 11 : i64} {
  func.func @_flash_attn_kernel(%arg0: i32, %arg1: i32, %arg2: i32, %arg3: memref<1x64x32xf32, #tpu.memory_space<vmem>>, %arg4: memref<1x64x32xf32, #tpu.memory_space<vmem>>, %arg5: memref<1x64x32xf32, #tpu.memory_space<vmem>>, %arg6: memref<1x64x32xf32, #tpu.memory_space<vmem>>, %arg7: memref<64x1xf32, #tpu.memory_space<vmem>>, %arg8: memref<64x1xf32, #tpu.memory_space<vmem>>, %arg9: memref<64x32xf32, #tpu.memory_space<vmem>>) attributes {dimension_semantics = [#tpu.dimension_semantics<parallel>, #tpu.dimension_semantics<parallel>, #tpu.dimension_semantics<arbitrary>], iteration_bounds = array<i64: 2, 1, 1>, scalar_prefetch = 0 : i64, scratch_operands = 3 : i64, tpu.core_type = #tpu.core_type<tc>, window_params = [{transform_indices = @transform_0, window_bounds = array<i64: 1, 64, 32>}, {transform_indices = @transform_1, window_bounds = array<i64: 1, 64, 32>}, {transform_indices = @transform_2, window_bounds = array<i64: 1, 64, 32>}, {transform_indices = @transform_3, window_bounds = array<i64: 1, 64, 32>}]} {
    %c0_i32 = arith.constant 0 : i32
    %0 = arith.cmpi eq, %arg2, %c0_i32 : i32
    %1 = arith.extui %0 : i1 to i32
    %c0_i32_0 = arith.constant 0 : i32
    %2 = arith.cmpi ne, %1, %c0_i32_0 : i32
    scf.if %2 {
      %cst_27 = arith.constant 0xFF800000 : f32
      %37 = vector.broadcast %cst_27 : f32 to vector<64x1xf32>
      %c0_28 = arith.constant 0 : index
      %c0_29 = arith.constant 0 : index
      %38 = vector.load %arg7[%c0_28, %c0_29] : memref<64x1xf32, #tpu.memory_space<vmem>>, vector<64x1xf32>
      tpu.vector_store %arg7[%c0_28, %c0_29], %37 {strides = array<i32>} : memref<64x1xf32, #tpu.memory_space<vmem>>, vector<64x1xf32>,
      %cst_30 = arith.constant 0.000000e+00 : f32
      %39 = vector.broadcast %cst_30 : f32 to vector<64x1xf32>
      %c0_31 = arith.constant 0 : index
      %c0_32 = arith.constant 0 : index
      %40 = vector.load %arg8[%c0_31, %c0_32] : memref<64x1xf32, #tpu.memory_space<vmem>>, vector<64x1xf32>
      tpu.vector_store %arg8[%c0_31, %c0_32], %39 {strides = array<i32>} : memref<64x1xf32, #tpu.memory_space<vmem>>, vector<64x1xf32>,
      %cst_33 = arith.constant 0.000000e+00 : f32
      %41 = vector.broadcast %cst_33 : f32 to vector<64x32xf32>
      %c0_34 = arith.constant 0 : index
      %c0_35 = arith.constant 0 : index
      %42 = vector.load %arg9[%c0_34, %c0_35] : memref<64x32xf32, #tpu.memory_space<vmem>>, vector<64x32xf32>
      tpu.vector_store %arg9[%c0_34, %c0_35], %41 {strides = array<i32>} : memref<64x32xf32, #tpu.memory_space<vmem>>, vector<64x32xf32>,
    } else {
    }
    %c0 = arith.constant 0 : index
    %c0_1 = arith.constant 0 : index
    %c0_2 = arith.constant 0 : index
    %3 = vector.load %arg3[%c0, %c0_1, %c0_2] : memref<1x64x32xf32, #tpu.memory_space<vmem>>, vector<1x64x32xf32>
    %4 = vector.shape_cast %3 : vector<1x64x32xf32> to vector<64x32xf32>
    %cst = arith.constant 0.353553385 : f32
    %5 = vector.broadcast %cst : f32 to vector<64x32xf32>
    %6 = arith.mulf %4, %5 : vector<64x32xf32>
    %c0_3 = arith.constant 0 : index
    %c0_4 = arith.constant 0 : index
    %c0_5 = arith.constant 0 : index
    %7 = vector.load %arg4[%c0_3, %c0_4, %c0_5] : memref<1x64x32xf32, #tpu.memory_space<vmem>>, vector<1x64x32xf32>
    %8 = vector.shape_cast %7 : vector<1x64x32xf32> to vector<64x32xf32>
    %c0_6 = arith.constant 0 : index
    %c0_7 = arith.constant 0 : index
    %c0_8 = arith.constant 0 : index
    %9 = vector.load %arg5[%c0_6, %c0_7, %c0_8] : memref<1x64x32xf32, #tpu.memory_space<vmem>>, vector<1x64x32xf32>
    %10 = vector.shape_cast %9 : vector<1x64x32xf32> to vector<64x32xf32>
    %cst_9 = arith.constant dense<0.000000e+00> : vector<64x64xf32>
    %11 = tpu.matmul %6, %8, %cst_9 {dimension_numbers = #tpu.dot_dimension_numbers<[1], [1], [0], [0], [0, 0, 1, 0], [], []>} : vector<64x32xf32>, vector<64x32xf32>, vector<64x64xf32> -> vector<64x64xf32>
    %c0_10 = arith.constant 0 : index
    %c0_11 = arith.constant 0 : index
    %12 = vector.load %arg7[%c0_10, %c0_11] : memref<64x1xf32, #tpu.memory_space<vmem>>, vector<64x1xf32>
    %cst_12 = arith.constant dense<0xFF800000> : vector<64xf32>
    %13 = vector.multi_reduction <maximumf>, %11, %cst_12 [1] : vector<64x64xf32> to vector<64xf32>
    %14 = vector.shape_cast %13 : vector<64xf32> to vector<64x1xf32>
    %15 = arith.maximumf %12, %14 : vector<64x1xf32>
    %16 = arith.subf %12, %15 : vector<64x1xf32>
    %17 = math.exp %16 : vector<64x1xf32>
    %18 = vector.broadcast %15 : vector<64x1xf32> to vector<64x64xf32>
    %19 = arith.subf %11, %18 : vector<64x64xf32>
    %20 = math.exp %19 : vector<64x64xf32>
    %c0_13 = arith.constant 0 : index
    %c0_14 = arith.constant 0 : index
    %21 = vector.load %arg8[%c0_13, %c0_14] : memref<64x1xf32, #tpu.memory_space<vmem>>, vector<64x1xf32>
    %22 = arith.mulf %17, %21 : vector<64x1xf32>
    %cst_15 = arith.constant dense<0.000000e+00> : vector<64xf32>
    %23 = vector.multi_reduction <add>, %20, %cst_15 [1] : vector<64x64xf32> to vector<64xf32>
    %24 = vector.shape_cast %23 : vector<64xf32> to vector<64x1xf32>
    %25 = arith.addf %22, %24 : vector<64x1xf32>
    %c0_16 = arith.constant 0 : index
    %c0_17 = arith.constant 0 : index
    %26 = vector.load %arg8[%c0_16, %c0_17] : memref<64x1xf32, #tpu.memory_space<vmem>>, vector<64x1xf32>
    tpu.vector_store %arg8[%c0_16, %c0_17], %25 {strides = array<i32>} : memref<64x1xf32, #tpu.memory_space<vmem>>, vector<64x1xf32>,
    %c0_18 = arith.constant 0 : index
    %c0_19 = arith.constant 0 : index
    %27 = vector.load %arg9[%c0_18, %c0_19] : memref<64x32xf32, #tpu.memory_space<vmem>>, vector<64x32xf32>
    %28 = vector.broadcast %17 : vector<64x1xf32> to vector<64x32xf32>
    %29 = arith.mulf %28, %27 : vector<64x32xf32>
    %cst_20 = arith.constant dense<0.000000e+00> : vector<64x32xf32>
    %30 = tpu.matmul %20, %10, %cst_20 {dimension_numbers = #tpu.dot_dimension_numbers<[1], [0], [0], [1], [0, 0, 1, 1], [], []>} : vector<64x64xf32>, vector<64x32xf32>, vector<64x32xf32> -> vector<64x32xf32>
    %31 = arith.addf %29, %30 : vector<64x32xf32>
    %c0_21 = arith.constant 0 : index
    %c0_22 = arith.constant 0 : index
    %32 = vector.load %arg9[%c0_21, %c0_22] : memref<64x32xf32, #tpu.memory_space<vmem>>, vector<64x32xf32>
    tpu.vector_store %arg9[%c0_21, %c0_22], %31 {strides = array<i32>} : memref<64x32xf32, #tpu.memory_space<vmem>>, vector<64x32xf32>,
    %c0_23 = arith.constant 0 : index
    %c0_24 = arith.constant 0 : index
    %33 = vector.load %arg7[%c0_23, %c0_24] : memref<64x1xf32, #tpu.memory_space<vmem>>, vector<64x1xf32>
    tpu.vector_store %arg7[%c0_23, %c0_24], %15 {strides = array<i32>} : memref<64x1xf32, #tpu.memory_space<vmem>>, vector<64x1xf32>,
    %c0_i32_25 = arith.constant 0 : i32
    %34 = arith.cmpi eq, %arg2, %c0_i32_25 : i32
    %35 = arith.extui %34 : i1 to i32
    %c0_i32_26 = arith.constant 0 : i32
    %36 = arith.cmpi ne, %35, %c0_i32_26 : i32
    scf.if %36 {
      %c0_27 = arith.constant 0 : index
      %c0_28 = arith.constant 0 : index
      %37 = vector.load %arg8[%c0_27, %c0_28] : memref<64x1xf32, #tpu.memory_space<vmem>>, vector<64x1xf32>
      %38 = tpu.reciprocal %37 {approx = true} : vector<64x1xf32> -> vector<64x1xf32>
      %39 = arith.mulf %37, %38 : vector<64x1xf32>
      %cst_29 = arith.constant 2.000000e+00 : f32
      %40 = vector.broadcast %cst_29 : f32 to vector<64x1xf32>
      %41 = arith.subf %40, %39 : vector<64x1xf32>
      %42 = arith.mulf %38, %41 : vector<64x1xf32>
      %c0_30 = arith.constant 0 : index
      %c0_31 = arith.constant 0 : index
      %43 = vector.load %arg9[%c0_30, %c0_31] : memref<64x32xf32, #tpu.memory_space<vmem>>, vector<64x32xf32>
      %44 = vector.broadcast %42 : vector<64x1xf32> to vector<64x32xf32>
      %45 = arith.mulf %43, %44 : vector<64x32xf32>
      %c0_32 = arith.constant 0 : index
      %c0_33 = arith.constant 0 : index
      %c0_34 = arith.constant 0 : index
      %46 = vector.load %arg6[%c0_32, %c0_33, %c0_34] : memref<1x64x32xf32, #tpu.memory_space<vmem>>, vector<1x64x32xf32>
      %47 = vector.shape_cast %46 : vector<1x64x32xf32> to vector<64x32xf32>
      %48 = vector.shape_cast %45 : vector<64x32xf32> to vector<1x64x32xf32>
      tpu.vector_store %arg6[%c0_32, %c0_33, %c0_34], %48 {strides = array<i32>} : memref<1x64x32xf32, #tpu.memory_space<vmem>>, vector<1x64x32xf32>,
    } else {
    }
    return
  }
  func.func @transform_0(%arg0: i32, %arg1: i32, %arg2: i32) -> (i32, i32, i32) {
    %c0_i32 = arith.constant 0 : i32
    %c0_i32_0 = arith.constant 0 : i32
    return %arg0, %arg1, %c0_i32 : i32, i32, i32
  }
  func.func @transform_1(%arg0: i32, %arg1: i32, %arg2: i32) -> (i32, i32, i32) {
    %c0_i32 = arith.constant 0 : i32
    %c0_i32_0 = arith.constant 0 : i32
    return %arg0, %arg2, %c0_i32 : i32, i32, i32
  }
  func.func @transform_2(%arg0: i32, %arg1: i32, %arg2: i32) -> (i32, i32, i32) {
    %c0_i32 = arith.constant 0 : i32
    %c0_i32_0 = arith.constant 0 : i32
    return %arg0, %arg2, %c0_i32 : i32, i32, i32
  }
  func.func @transform_3(%arg0: i32, %arg1: i32, %arg2: i32) -> (i32, i32, i32) {
    %c0_i32 = arith.constant 0 : i32
    %c0_i32_0 = arith.constant 0 : i32
    return %arg0, %arg1, %c0_i32 : i32, i32, i32
  }
}

</mosaic_0001>

<bundles_post_ra>
// kernel: tpu_custom_call.1
= control target key start
LH: loop header
LB: loop body
LE: loop exit
PB: predicated region body
PF: predicated region fallthrough
CT: control target
= control target key end

     0   :  { %s1388_s12 = smov 0   ;;  %s1390_s13 = smov 0   ;;  %s1695_s0 = inlined_call_operand.vmem [shape: f32[2,64,32], index: 0, kind: input, shape index: {}]   ;;  %s1696_s1 = inlined_call_operand.vmem [shape: f32[2,64,32], index: 1, kind: input, shape index: {}]   ;;  %s1697_s2 = inlined_call_operand.vmem [shape: f32[2,64,32], index: 2, kind: input, shape index: {}]   ;;  %s1698_s3 = inlined_call_operand.vmem [shape: f32[2,64,32], index: 3, kind: output, shape index: {}]  }
   0x1   :  { %s1392_s14 = smov 0  }
   0x2 LB: > { %s32_s15 = sadd.s32 1, %s1359_s13  ;;  %p1137_p0 = scmp.ge.s32.totalorder %s1363_s14, 1  ;;  %s1363_s14 = sphi %s1392_s14, %s13_s14   ;;  %s1359_s13 = sphi %s1390_s13, %s1700_s13   ;;  %s1355_s12 = sphi %s1388_s12, %s1699_s12  }
   0x3   : > { %p34_p1 = scmp.ge.s32.totalorder %s32_s15, 2  ;;  %p199_p2 = scmp.lt.s32.totalorder %s1363_s14, 3 }
   0x5   : > { %s1702_s15 = smov (%p34_p1, %s32_s15), 0  ;;  %p200_p3 = pnand %p1137_p0, %p199_p2 }
   0x6   : > { %p250_p4 = scmp.lt.s32.totalorder (!%p200_p3), %s1355_s12, 1 }
   0x7   : > { %203 = sbr.rel (%p200_p3) target bundleno = 850 (0x352), region = 32 }
   0xc   : > { %s1704_s12 = smov (!%p250_p4, %s1355_s12), 1  ;;  %vm310_vm0 = vcmask 261120   ;;  %vm293_vm1 = vcmask 7168   ;;  %v1365_v24 = vmov -inf   ;;  %vm513_vm2 = vcmask 523264  }
   0xd   : > { %s1406_s16 = sshll.u32 %s1704_s12, 6  ;;  %294 = vst.msk [vmem:[#allocation2] sm:$0xff] %vm293_vm1, %v1365_v24  ;;  %295 = vst.msk [vmem:[#allocation2 + $0x8] sm:$0xff] %vm293_vm1, %v1365_v24  ;;  %v1366_v40 = vmov 0   ;;  %v1367_v42 = vmov 0.0  }
   0xe   : > { %s267_s19 = scalar_lea.vmem %s1696_s1, %s1406_s16  ;;  %s1416_s22 = scalar_lea.vmem %s1695_s0, %s1406_s16  ;;  %296 = vst.msk [vmem:[#allocation2 + $0x10] sm:$0xff] %vm293_vm1, %v1365_v24  ;;  %297 = vst.msk [vmem:[#allocation2 + $0x18] sm:$0xff] %vm293_vm1, %v1365_v24  ;;  %1291 = vset.pattern.permute.xlu0 %v1366_v40  ;;  %1292 = vset.pattern.permute.xlu1 %v1366_v40 }
   0xf   : > { %v342_v0 = vld [vmem:[%s267_s19 + $0x38] sm:$0xff]  ;;  %v341_v1 = vld [vmem:[%s267_s19 + $0x30] sm:$0xff]  ;;  %v319_v2 = vld [vmem:[%s1416_s22] sm:$0xff]  ;;  %298 = vst.msk [vmem:[#allocation2 + $0x20] sm:$0xff] %vm293_vm1, %v1365_v24  ;;  %s1524_s25 = scalar_lea.vmem %s1697_s2, %s1406_s16  ;;  %s1668_s28 = scalar_lea.vmem %s1698_s3, %s1406_s16 }
  0x10   : > { %1208 = vmatprep.subr.msk.mxu0 %vm310_vm0, %v342_v0  ;;  %v327_v3 = vmul.f32 0.35355338, %v319_v2  ;;  %v340_v4 = vld [vmem:[%s267_s19 + $0x28] sm:$0xff]  ;;  %v339_v5 = vld [vmem:[%s267_s19 + $0x20] sm:$0xff]  ;;  %v338_v6 = vld [vmem:[%s267_s19 + $0x18] sm:$0xff]  ;;  %299 = vst.msk [vmem:[#allocation2 + $0x28] sm:$0xff] %vm293_vm1, %v1365_v24 }
  0x11   : > { %1209 = vmatpush3.xpose.msk.msra.mxu0 %vm310_vm0, %v342_v0  ;;  %v337_v7 = vld [vmem:[%s267_s19 + $0x10] sm:$0xff]  ;;  %v336_v8 = vld [vmem:[%s267_s19 + $0x8] sm:$0xff]  ;;  %v335_v9 = vld [vmem:[%s267_s19] sm:$0xff]  ;;  %300 = vst.msk [vmem:[#allocation2 + $0x30] sm:$0xff] %vm293_vm1, %v1365_v24 }
  0x12   : > { %1210 = vmatprep.subr.msk.mxu0 %vm310_vm0, %v341_v1  ;;  %1224 = vmatprep.mubr.msk.f32.mxu0 %vm310_vm0, %v327_v3  ;;  %v320_v10 = vld [vmem:[%s1416_s22 + $0x8] sm:$0xff]  ;;  %v321_v11 = vld [vmem:[%s1416_s22 + $0x10] sm:$0xff]  ;;  %v322_v14 = vld [vmem:[%s1416_s22 + $0x18] sm:$0xff]  ;;  %301 = vst.msk [vmem:[#allocation2 + $0x38] sm:$0xff] %vm293_vm1, %v1365_v24 }
  0x13   : > { %v328_v12 = vmul.f32 0.35355338, %v320_v10  ;;  %v329_v13 = vmul.f32 0.35355338, %v321_v11  ;;  %v323_v15 = vld [vmem:[%s1416_s22 + $0x20] sm:$0xff]  ;;  %v324_v18 = vld [vmem:[%s1416_s22 + $0x28] sm:$0xff] }
  0x14   : > { %v330_v16 = vmul.f32 0.35355338, %v322_v14  ;;  %v331_v17 = vmul.f32 0.35355338, %v323_v15  ;;  %v325_v19 = vld [vmem:[%s1416_s22 + $0x30] sm:$0xff]  ;;  %v326_v22 = vld [vmem:[%s1416_s22 + $0x38] sm:$0xff] }
  0x15   : > { %1211 = vmatpush3.xpose.msk.msra.mxu0 %vm310_vm0, %v341_v1  ;;  %v332_v20 = vmul.f32 0.35355338, %v324_v18  ;;  %v333_v21 = vmul.f32 0.35355338, %v325_v19  ;;  %v334_v23 = vmul.f32 0.35355338, %v326_v22 }
  0x16   : > { %1212 = vmatprep.subr.msk.mxu0 %vm310_vm0, %v340_v4  ;;  %302 = vst.msk [vmem:[#allocation3] sm:$0xff] %vm293_vm1, %v1367_v42  ;;  %303 = vst.msk [vmem:[#allocation3 + $0x8] sm:$0xff] %vm293_vm1, %v1367_v42  ;;  %v1506_v43 = vld [vmem:[#allocation2] sm:$0xff]  ;;  %v1511_v46 = vld [vmem:[#allocation2 + $0x8] sm:$0xff] }
  0x17   : > { %304 = vst.msk [vmem:[#allocation3 + $0x10] sm:$0xff] %vm293_vm1, %v1367_v42  ;;  %305 = vst.msk [vmem:[#allocation3 + $0x18] sm:$0xff] %vm293_vm1, %v1367_v42  ;;  %v1513_v47 = vld [vmem:[#allocation2 + $0x10] sm:$0xff]  ;;  %v350_v53 = vld [vmem:[%s1524_s25 + $0x38] sm:$0xff] }
  0x18   : > { %306 = vst.msk [vmem:[#allocation3 + $0x20] sm:$0xff] %vm293_vm1, %v1367_v42  ;;  %307 = vst.msk [vmem:[#allocation3 + $0x28] sm:$0xff] %vm293_vm1, %v1367_v42  ;;  %v1533_v54 = vld [vmem:[#allocation2 + $0x18] sm:$0xff]  ;;  %v1535_v55 = vld [vmem:[#allocation2 + $0x20] sm:$0xff]  ;;  %1236 = vmatprep.subr.mxu1 %v350_v53 }
  0x19   : > { %1213 = vmatpush3.xpose.msk.msra.mxu0 %vm310_vm0, %v340_v4  ;;  %308 = vst.msk [vmem:[#allocation3 + $0x30] sm:$0xff] %vm293_vm1, %v1367_v42  ;;  %309 = vst.msk [vmem:[#allocation3 + $0x38] sm:$0xff] %vm293_vm1, %v1367_v42  ;;  %1237 = vmatpush3.msra.mxu1 %v350_v53  ;;  %v349_v58 = vld [vmem:[%s1524_s25 + $0x30] sm:$0xff]  ;;  %v348_v63 = vld [vmem:[%s1524_s25 + $0x28] sm:$0xff] }
  0x1a   : > { %1214 = vmatprep.subr.msk.mxu0 %vm310_vm0, %v339_v5  ;;  %311 = vst.msk [vmem:[#allocation4] sm:$0xff] %vm310_vm0, %v1367_v42  ;;  %312 = vst.msk [vmem:[#allocation4 + $0x8] sm:$0xff] %vm310_vm0, %v1367_v42  ;;  %1238 = vmatprep.subr.mxu1 %v349_v58  ;;  %v1554_v0 = vld [vmem:[#allocation2 + $0x28] sm:$0xff]  ;;  %v1556_v1 = vld [vmem:[#allocation2 + $0x30] sm:$0xff] }
  0x1b   : > { %313 = vst.msk [vmem:[#allocation4 + $0x10] sm:$0xff] %vm310_vm0, %v1367_v42  ;;  %314 = vst.msk [vmem:[#allocation4 + $0x18] sm:$0xff] %vm310_vm0, %v1367_v42  ;;  %1239 = vmatpush3.msra.mxu1 %v349_v58  ;;  %v347_v4 = vld [vmem:[%s1524_s25 + $0x20] sm:$0xff]  ;;  %v1575_v10 = vld [vmem:[#allocation2 + $0x38] sm:$0xff] }
  0x1c   : > { %315 = vst.msk [vmem:[#allocation4 + $0x20] sm:$0xff] %vm310_vm0, %v1367_v42  ;;  %316 = vst.msk [vmem:[#allocation4 + $0x28] sm:$0xff] %vm310_vm0, %v1367_v42  ;;  %1240 = vmatprep.subr.mxu1 %v348_v63  ;;  %v343_v18 = vld [vmem:[%s1524_s25] sm:$0xff] }
  0x1d   : > { %1215 = vmatpush3.xpose.msk.msra.mxu0 %vm310_vm0, %v339_v5  ;;  %317 = vst.msk [vmem:[#allocation4 + $0x30] sm:$0xff] %vm310_vm0, %v1367_v42  ;;  %318 = vst.msk [vmem:[#allocation4 + $0x38] sm:$0xff] %vm310_vm0, %v1367_v42  ;;  %1241 = vmatpush3.msra.mxu1 %v348_v63 }
  0x1e   : > { %1216 = vmatprep.subr.msk.mxu0 %vm310_vm0, %v338_v6  ;;  %1242 = vmatprep.subr.mxu1 %v347_v4 }
  0x1f   : > { %1243 = vmatpush3.msra.mxu1 %v347_v4 }
  0x21   : > { %1217 = vmatpush3.xpose.msk.msra.mxu0 %vm310_vm0, %v338_v6 }
  0x22   : > { %1218 = vmatprep.subr.msk.mxu0 %vm310_vm0, %v337_v7 }
  0x25   : > { %1219 = vmatpush3.xpose.msk.msra.mxu0 %vm310_vm0, %v337_v7 }
  0x26   : > { %1220 = vmatprep.subr.msk.mxu0 %vm310_vm0, %v336_v8 }
  0x29   : > { %1221 = vmatpush3.xpose.msk.msra.mxu0 %vm310_vm0, %v336_v8 }
  0x2a   : > { %1222 = vmatprep.subr.msk.mxu0 %vm310_vm0, %v335_v9 }
  0x2d   : > { %1223 = vmatpush3.xpose.msk.msra.mxu0 %vm310_vm0, %v335_v9  ;;  %v346_v9 = vld [vmem:[%s1524_s25 + $0x18] sm:$0xff] }
  0x2e   : > { %1244 = vmatprep.subr.mxu1 %v346_v9 }
  0x2f   : > { %1245 = vmatpush3.msra.mxu1 %v346_v9 }
  0x30   : > { %1225 = vmatmul.mubr.msk.f32.vlgmr.msra.gmra.mxu0 %vm310_vm0, %v328_v12 }
  0x31   : > { %1227 = vmatprep.mubr.msk.f32.mxu0 %vm310_vm0, %v329_v13  ;;  %v345_v13 = vld [vmem:[%s1524_s25 + $0x10] sm:$0xff] }
  0x32   : > { %1246 = vmatprep.subr.mxu1 %v345_v13 }
  0x33   : > { %1247 = vmatpush3.msra.mxu1 %v345_v13 }
  0x34   : > { %1228 = vmatmul.mubr.msk.f32.gmra.mxu0 %vm310_vm0, %v330_v16  ;;  %v344_v16 = vld [vmem:[%s1524_s25 + $0x8] sm:$0xff] }
  0x35   : > { %1230 = vmatprep.mubr.msk.f32.mxu0 %vm310_vm0, %v331_v17  ;;  %1248 = vmatprep.subr.mxu1 %v344_v16 }
  0x36   : > { %1249 = vmatpush3.msra.mxu1 %v344_v16 }
  0x37   : > { %1250 = vmatprep.subr.mxu1 %v343_v18 }
  0x38   : > { %1231 = vmatmul.mubr.msk.f32.gmra.mxu0 %vm310_vm0, %v332_v20  ;;  %1251 = vmatpush3.msra.mxu1 %v343_v18 }
  0x39   : > { %1233 = vmatprep.mubr.msk.f32.mxu0 %vm310_vm0, %v333_v21 }
  0x3c   : > { %1234 = vmatmul.mubr.msk.f32.gmra.mxu0 %vm310_vm0, %v334_v23 }
  0xf0   : > { %v1458_v25 = vpop.f32.mrf.mxu0 }
  0xf1   : > { %v517_v30 = vsel %vm513_vm2, %v1458_v25, -inf }
  0xf2   : > { %v1460_v26 = vpop.f32.mrf.mxu0 }
  0xf3   : > { %v514_v27 = vsel %vm513_vm2, %v1460_v26, -inf }
  0xf4   : > { %515 = vmax.xlane.f32.xlu0 %v514_v27  ;;  %v1464_v28 = vpop.f32.mrf.mxu0 }
  0xf5   : > { %v523_v34 = vsel %vm513_vm2, %v1464_v28, -inf }
  0xf6   : > { %v1466_v29 = vpop.f32.mrf.mxu0 }
  0xf7   : > { %v520_v31 = vsel %vm513_vm2, %v1466_v29, -inf }
  0xf8   : > { %518 = vmax.xlane.f32.xlu0 %v517_v30  ;;  %521 = vmax.xlane.f32.xlu1 %v520_v31  ;;  %v1472_v32 = vpop.f32.mrf.mxu0 }
  0xf9   : > { %v529_v37 = vsel %vm513_vm2, %v1472_v32, -inf }
  0xfa   : > { %v1474_v33 = vpop.f32.mrf.mxu0 }
  0xfb   : > { %v526_v35 = vsel %vm513_vm2, %v1474_v33, -inf }
  0xfc   : > { %524 = vmax.xlane.f32.xlu1 %v523_v34  ;;  %527 = vmax.xlane.f32.xlu0 %v526_v35  ;;  %v1480_v36 = vpop.f32.mrf.mxu0 }
  0xfd   : > { %v535_v41 = vsel %vm513_vm2, %v1480_v36, -inf }
  0xfe   : > { %v1484_v38 = vpop.f32.mrf.mxu0 }
  0xff   : > { %v532_v39 = vsel %vm513_vm2, %v1484_v38, -inf }
 0x100   : > { %530 = vmax.xlane.f32.xlu1 %v529_v37  ;;  %533 = vmax.xlane.f32.xlu0 %v532_v39 }
 0x104   : > { %536 = vmax.xlane.f32.xlu1 %v535_v41 }
 0x17d   : > { %v516_v44 = vpop.xlane.xlu0 %515 }
 0x17e   : > { %v1509_v45 = vmax.f32 %v1506_v43, %v516_v44 }
 0x180   : > { %v546_v48 = vsub.f32 %v1506_v43, %v1509_v45  ;;  %892 = vst.msk [vmem:[#allocation2] sm:$0xff] %vm293_vm1, %v1509_v45  ;;  %572 = vperm.xlu0 %1291, %v1509_v45  }
 0x181   : > { %v519_v49 = vpop.xlane.xlu0 %518  ;;  %v522_v50 = vpop.xlane.xlu1 %521 }
 0x182   : > { %v1527_v51 = vmax.f32 %v1511_v46, %v519_v49  ;;  %v1530_v52 = vmax.f32 %v1513_v47, %v522_v50 }
 0x184   : > { %v547_v56 = vsub.f32 %v1511_v46, %v1527_v51  ;;  %893 = vst.msk [vmem:[#allocation2 + $0x8] sm:$0xff] %vm293_vm1, %v1527_v51  ;;  %v548_v57 = vsub.f32 %v1513_v47, %v1530_v52  ;;  %894 = vst.msk [vmem:[#allocation2 + $0x10] sm:$0xff] %vm293_vm1, %v1530_v52  ;;  %577 = vperm.xlu1 %1292, %v1527_v51  }
 0x185   : > { %v525_v59 = vpop.xlane.xlu1 %524  ;;  %v528_v60 = vpop.xlane.xlu0 %527 }
 0x186   : > { %v1548_v61 = vmax.f32 %v1533_v54, %v525_v59  ;;  %v1551_v62 = vmax.f32 %v1535_v55, %v528_v60  ;;  %v556_v18 = vmul.f32 1.442695, %v547_v56 }
 0x188   : > { %v549_v2 = vsub.f32 %v1533_v54, %v1548_v61  ;;  %895 = vst.msk [vmem:[#allocation2 + $0x18] sm:$0xff] %vm293_vm1, %v1548_v61  ;;  %587 = vperm.xlu1 %1292, %v1548_v61   ;;  %v550_v3 = vsub.f32 %v1535_v55, %v1551_v62  ;;  %896 = vst.msk [vmem:[#allocation2 + $0x20] sm:$0xff] %vm293_vm1, %v1551_v62 }
 0x189   : > { %v531_v5 = vpop.xlane.xlu1 %530  ;;  %v534_v6 = vpop.xlane.xlu0 %533 }
 0x18a   : > { %v1569_v7 = vmax.f32 %v1554_v0, %v531_v5  ;;  %v1572_v8 = vmax.f32 %v1556_v1, %v534_v6  ;;  %v560_v46 = vmul.f32 1.442695, %v549_v2  ;;  %v562_v51 = vmul.f32 1.442695, %v550_v3  ;;  %v635_v3 = vld [vmem:[#allocation3 + $0x8] sm:$0xff] }
 0x18c   : > { %582 = vperm.xlu1 %1292, %v1530_v52   ;;  %v551_v11 = vsub.f32 %v1554_v0, %v1569_v7  ;;  %897 = vst.msk [vmem:[#allocation2 + $0x28] sm:$0xff] %vm293_vm1, %v1569_v7  ;;  %v552_v12 = vsub.f32 %v1556_v1, %v1572_v8  ;;  %898 = vst.msk [vmem:[#allocation2 + $0x30] sm:$0xff] %vm293_vm1, %v1572_v8  ;;  %v634_v0 = vld [vmem:[#allocation3] sm:$0xff] }
 0x18d   : > { %v537_v14 = vpop.xlane.xlu1 %536 }
 0x18e   : > { %v1588_v15 = vmax.f32 %v1575_v10, %v537_v14  ;;  %v564_v43 = vmul.f32 1.442695, %v551_v11  ;;  %v566_v45 = vmul.f32 1.442695, %v552_v12  ;;  %v637_v11 = vld [vmem:[#allocation3 + $0x18] sm:$0xff] }
 0x190   : > { %597 = vperm.xlu1 %1292, %v1569_v7   ;;  %v553_v17 = vsub.f32 %v1575_v10, %v1588_v15  ;;  %899 = vst.msk [vmem:[#allocation2 + $0x38] sm:$0xff] %vm293_vm1, %v1588_v15 }
 0x192   : > { %v568_v47 = vmul.f32 1.442695, %v553_v17 }
 0x194   : > { %592 = vperm.xlu1 %1292, %v1551_v62  }
 0x198   : > { %602 = vperm.xlu1 %1292, %v1572_v8  }
 0x19c   : > { %607 = vperm.xlu1 %1292, %v1588_v15  }
 0x1fb   : > { %v573_v19 = vpop.permute.xlu0 %572 }
 0x1fc   : > { %v610_v20 = vsub.f32 %v1460_v26, %v573_v19 }
 0x1fe   : > { %v618_v21 = vmul.f32 1.442695, %v610_v20  ;;  %v554_v20 = vmul.f32 1.442695, %v546_v48 }
 0x1ff   : > { %v578_v22 = vpop.permute.xlu1 %577 }
 0x200   : > { %1293 = vpow2.f32 %v618_v21  ;;  %v611_v23 = vsub.f32 %v1458_v25, %v578_v22  ;;  %v558_v21 = vmul.f32 1.442695, %v548_v57  ;;  %v636_v22 = vld [vmem:[#allocation3 + $0x10] sm:$0xff] }
 0x202   : > { %v620_v24 = vmul.f32 1.442695, %v611_v23 }
 0x203   : > { %v588_v27 = vpop.permute.xlu1 %587 }
 0x204   : > { %1295 = vpow2.f32 %v620_v24  ;;  %v613_v30 = vsub.f32 %v1464_v28, %v588_v27 }
 0x206   : > { %v624_v31 = vmul.f32 1.442695, %v613_v30 }
 0x207   : > { %v583_v34 = vpop.permute.xlu1 %582 }
 0x208   : > { %1297 = vpow2.f32 %v624_v31  ;;  %v612_v35 = vsub.f32 %v1466_v29, %v583_v34  ;;  %v639_v31 = vld [vmem:[#allocation3 + $0x28] sm:$0xff] }
 0x20a   : > { %v622_v37 = vmul.f32 1.442695, %v612_v35 }
 0x20b   : > { %v598_v39 = vpop.permute.xlu1 %597 }
 0x20c   : > { %1299 = vpow2.f32 %v622_v37  ;;  %v615_v26 = vsub.f32 %v1472_v32, %v598_v39 }
 0x20d   : > { %v1294_v40 = vpop.eup %1293 }
 0x20e   : > { %v628_v41 = vmul.f32 1.442695, %v615_v26  ;;  %1252 = vmatprep.mubr.msk.f32.mxu1 %vm513_vm2, %v1294_v40  ;;  %v650_v25 = vsel %vm513_vm2, %v1294_v40, 0.0  ;;  %v638_v26 = vld [vmem:[#allocation3 + $0x20] sm:$0xff] }
 0x20f   : > { %v593_v42 = vpop.permute.xlu1 %592  ;;  %651 = vadd.xlane.f32.xlu1 %v650_v25 }
 0x210   : > { %1301 = vpow2.f32 %v628_v41  ;;  %v614_v28 = vsub.f32 %v1474_v33, %v593_v42 }
 0x211   : > { %v1296_v44 = vpop.eup %1295 }
 0x212   : > { %v626_v49 = vmul.f32 1.442695, %v614_v28  ;;  %1253 = vmatmul.mubr.msk.f32.vlgmr.msra.gmra.mxu1 %vm513_vm2, %v1296_v44  ;;  %v653_v29 = vsel %vm513_vm2, %v1296_v44, 0.0  ;;  %v640_v28 = vld [vmem:[#allocation3 + $0x30] sm:$0xff] }
 0x213   : > { %654 = vadd.xlane.f32.xlu0 %v653_v29  ;;  %v603_v50 = vpop.permute.xlu1 %602 }
 0x214   : > { %1303 = vpow2.f32 %v626_v49  ;;  %v616_v32 = vsub.f32 %v1484_v38, %v603_v50 }
 0x215   : > { %v1298_v53 = vpop.eup %1297 }
 0x216   : > { %v630_v58 = vmul.f32 1.442695, %v616_v32  ;;  %v659_v59 = vsel %vm513_vm2, %v1298_v53, 0.0 }
 0x217   : > { %v608_v60 = vpop.permute.xlu1 %607  ;;  %660 = vadd.xlane.f32.xlu1 %v659_v59 }
 0x218   : > { %1305 = vpow2.f32 %v630_v58  ;;  %v617_v33 = vsub.f32 %v1480_v36, %v608_v60 }
 0x219   : > { %v1300_v63 = vpop.eup %1299 }
 0x21a   : > { %v632_v4 = vmul.f32 1.442695, %v617_v33  ;;  %1255 = vmatprep.mubr.msk.f32.mxu1 %vm513_vm2, %v1300_v63  ;;  %v656_v5 = vsel %vm513_vm2, %v1300_v63, 0.0 }
 0x21b   : > { %657 = vadd.xlane.f32.xlu0 %v656_v5  ;;  %1256 = vmatmul.mubr.msk.f32.gmra.mxu1 %vm513_vm2, %v1298_v53  ;;  %v641_v53 = vld [vmem:[#allocation3 + $0x38] sm:$0xff] }
 0x21c   : > { %1307 = vpow2.f32 %v632_v4 }
 0x21d   : > { %v1302_v38 = vpop.eup %1301  ;;  %1309 = vpow2.f32 %v556_v18 }
 0x21e   : > { %v665_v6 = vsel %vm513_vm2, %v1302_v38, 0.0  ;;  %1311 = vpow2.f32 %v554_v20 }
 0x21f   : > { %666 = vadd.xlane.f32.xlu1 %v665_v6  ;;  %1313 = vpow2.f32 %v558_v21 }
 0x220   : > { %1315 = vpow2.f32 %v560_v46 }
 0x221   : > { %v1304_v9 = vpop.eup %1303  ;;  %1317 = vpow2.f32 %v562_v51 }
 0x222   : > { %1258 = vmatprep.mubr.msk.f32.mxu1 %vm513_vm2, %v1304_v9  ;;  %v662_v13 = vsel %vm513_vm2, %v1304_v9, 0.0  ;;  %1319 = vpow2.f32 %v564_v43 }
 0x223   : > { %663 = vadd.xlane.f32.xlu0 %v662_v13  ;;  %1259 = vmatmul.mubr.msk.f32.gmra.mxu1 %vm513_vm2, %v1302_v38  ;;  %1321 = vpow2.f32 %v566_v45 }
 0x224   : > { %1323 = vpow2.f32 %v568_v47 }
 0x225   : > { %v1306_v36 = vpop.eup %1305 }
 0x226   : > { %1261 = vmatprep.mubr.msk.f32.mxu1 %vm513_vm2, %v1306_v36  ;;  %v668_v14 = vsel %vm513_vm2, %v1306_v36, 0.0 }
 0x227   : > { %669 = vadd.xlane.f32.xlu0 %v668_v14 }
 0x229   : > { %v1308_v16 = vpop.eup %1307 }
 0x22a   : > { %1262 = vmatmul.mubr.msk.f32.gmra.mxu1 %vm513_vm2, %v1308_v16  ;;  %v671_v19 = vsel %vm513_vm2, %v1308_v16, 0.0  ;;  %v1310_v48 = vpop.eup %1309 }
 0x22b   : > { %672 = vadd.xlane.f32.xlu1 %v671_v19  ;;  %v1312_v52 = vpop.eup %1311  ;;  %v643_v8 = vmul.f32 %v1310_v48, %v635_v3 }
 0x22c   : > { %v1314_v54 = vpop.eup %1313  ;;  %v642_v1 = vmul.f32 %v1312_v52, %v634_v0 }
 0x22d   : > { %v1316_v55 = vpop.eup %1315  ;;  %v644_v27 = vmul.f32 %v1314_v54, %v636_v22 }
 0x22e   : > { %v1318_v56 = vpop.eup %1317  ;;  %v645_v15 = vmul.f32 %v1316_v55, %v637_v11 }
 0x22f   : > { %v1320_v57 = vpop.eup %1319  ;;  %v646_v25 = vmul.f32 %v1318_v56, %v638_v26 }
 0x230   : > { %v1322_v61 = vpop.eup %1321  ;;  %v647_v37 = vmul.f32 %v1320_v57, %v639_v31 }
 0x231   : > { %v1324_v62 = vpop.eup %1323  ;;  %v648_v29 = vmul.f32 %v1322_v61, %v640_v28 }
 0x232   : > { %v649_v33 = vmul.f32 %v1324_v62, %v641_v53 }
 0x23c   : > { %706 = vperm.xlu1 %1292, %v1310_v48  }
 0x23d   : > { %701 = vperm.xlu0 %1291, %v1312_v52  }
 0x240   : > { %711 = vperm.xlu1 %1292, %v1314_v54  }
 0x241   : > { %716 = vperm.xlu0 %1291, %v1316_v55  }
 0x244   : > { %721 = vperm.xlu1 %1292, %v1318_v56  }
 0x245   : > { %726 = vperm.xlu0 %1291, %v1320_v57  }
 0x248   : > { %731 = vperm.xlu1 %1292, %v1322_v61  }
 0x249   : > { %736 = vperm.xlu0 %1291, %v1324_v62  }
 0x298   : > { %v652_v2 = vpop.xlane.xlu1 %651 }
 0x299   : > { %v674_v7 = vadd.f32 %v652_v2, %v642_v1 }
 0x29b   : > { %683 = vst.msk [vmem:[#allocation3] sm:$0xff] %vm293_vm1, %v674_v7 }
 0x29c   : > { %v655_v10 = vpop.xlane.xlu0 %654 }
 0x29d   : > { %v675_v12 = vadd.f32 %v655_v10, %v643_v8  ;;  %v692_v10 = vld [vmem:[#allocation4 + $0x8] sm:$0xff] }
 0x29f   : > { %684 = vst.msk [vmem:[#allocation3 + $0x8] sm:$0xff] %vm293_vm1, %v675_v12 }
 0x2a0   : > { %v661_v17 = vpop.xlane.xlu1 %660 }
 0x2a1   : > { %v677_v23 = vadd.f32 %v661_v17, %v645_v15  ;;  %v691_v15 = vld [vmem:[#allocation4] sm:$0xff] }
 0x2a2   : > { %v903_v24 = vld [vmem:[#allocation3] sm:$0xff] }
 0x2a3   : > { %686 = vst.msk [vmem:[#allocation3 + $0x18] sm:$0xff] %vm293_vm1, %v677_v23  ;;  %1325 = vrcp.f32 %v903_v24 }
 0x2a4   : > { %v658_v30 = vpop.xlane.xlu0 %657 }
 0x2a5   : > { %v676_v34 = vadd.f32 %v658_v30, %v644_v27 }
 0x2a6   : > { %v904_v35 = vld [vmem:[#allocation3 + $0x8] sm:$0xff] }
 0x2a7   : > { %685 = vst.msk [vmem:[#allocation3 + $0x10] sm:$0xff] %vm293_vm1, %v676_v34  ;;  %1327 = vrcp.f32 %v904_v35 }
 0x2a8   : > { %v667_v39 = vpop.xlane.xlu1 %666 }
 0x2a9   : > { %v679_v40 = vadd.f32 %v667_v39, %v647_v37  ;;  %v693_v39 = vld [vmem:[#allocation4 + $0x10] sm:$0xff] }
 0x2aa   : > { %v906_v41 = vld [vmem:[#allocation3 + $0x18] sm:$0xff] }
 0x2ab   : > { %688 = vst.msk [vmem:[#allocation3 + $0x28] sm:$0xff] %vm293_vm1, %v679_v40  ;;  %1329 = vrcp.f32 %v906_v41 }
 0x2ac   : > { %v664_v42 = vpop.xlane.xlu0 %663 }
 0x2ad   : > { %v678_v44 = vadd.f32 %v664_v42, %v646_v25 }
 0x2ae   : > { %v905_v49 = vld [vmem:[#allocation3 + $0x10] sm:$0xff] }
 0x2af   : > { %687 = vst.msk [vmem:[#allocation3 + $0x20] sm:$0xff] %vm293_vm1, %v678_v44  ;;  %1331 = vrcp.f32 %v905_v49 }
 0x2b0   : > { %v1326_v50 = vpop.eup %1325  ;;  %v670_v32 = vpop.xlane.xlu0 %669 }
 0x2b1   : > { %v680_v58 = vadd.f32 %v670_v32, %v648_v29  ;;  %v919_v59 = vmul.f32 %v1326_v50, %v903_v24 }
 0x2b2   : > { %v908_v60 = vld [vmem:[#allocation3 + $0x28] sm:$0xff] }
 0x2b3   : > { %689 = vst.msk [vmem:[#allocation3 + $0x30] sm:$0xff] %vm293_vm1, %v680_v58  ;;  %v927_v63 = vsub.f32 2.0, %v919_v59  ;;  %1333 = vrcp.f32 %v908_v60 }
 0x2b4   : > { %v1328_v4 = vpop.eup %1327  ;;  %v673_v5 = vpop.xlane.xlu1 %672 }
 0x2b5   : > { %v681_v38 = vadd.f32 %v673_v5, %v649_v33  ;;  %v935_v6 = vmul.f32 %v1326_v50, %v927_v63  ;;  %v920_v9 = vmul.f32 %v1328_v4, %v904_v35  ;;  %v694_v35 = vld [vmem:[#allocation4 + $0x18] sm:$0xff]  ;;  %v695_v50 = vld [vmem:[#allocation4 + $0x20] sm:$0xff] }
 0x2b6   : > { %v907_v13 = vld [vmem:[#allocation3 + $0x20] sm:$0xff]  ;;  %v698_v63 = vld [vmem:[#allocation4 + $0x38] sm:$0xff] }
 0x2b7   : > { %690 = vst.msk [vmem:[#allocation3 + $0x38] sm:$0xff] %vm293_vm1, %v681_v38  ;;  %953 = vperm.xlu1 %1292, %v935_v6   ;;  %v928_v36 = vsub.f32 2.0, %v920_v9  ;;  %1335 = vrcp.f32 %v907_v13  ;;  %v697_v38 = vld [vmem:[#allocation4 + $0x30] sm:$0xff] }
 0x2b8   : > { %v1330_v14 = vpop.eup %1329  ;;  %v707_v11 = vpop.permute.xlu1 %706 }
 0x2b9   : > { %v936_v16 = vmul.f32 %v1328_v4, %v928_v36  ;;  %v922_v18 = vmul.f32 %v1330_v14, %v906_v41  ;;  %v702_v17 = vpop.permute.xlu0 %701  ;;  %v740_v22 = vmul.f32 %v707_v11, %v692_v10 }
 0x2ba   : > { %v909_v19 = vld [vmem:[#allocation3 + $0x30] sm:$0xff]  ;;  %v739_v27 = vmul.f32 %v702_v17, %v691_v15 }
 0x2bb   : > { %958 = vperm.xlu0 %1291, %v936_v16   ;;  %v930_v20 = vsub.f32 2.0, %v922_v18  ;;  %1337 = vrcp.f32 %v909_v19 }
 0x2bc   : > { %v1332_v21 = vpop.eup %1331  ;;  %v712_v26 = vpop.permute.xlu1 %711 }
 0x2bd   : > { %v938_v46 = vmul.f32 %v1330_v14, %v930_v20  ;;  %v921_v51 = vmul.f32 %v1332_v21, %v905_v49  ;;  %v717_v37 = vpop.permute.xlu0 %716  ;;  %v741_v25 = vmul.f32 %v712_v26, %v693_v39  ;;  %v696_v49 = vld [vmem:[#allocation4 + $0x28] sm:$0xff] }
 0x2be   : > { %v910_v43 = vld [vmem:[#allocation3 + $0x38] sm:$0xff]  ;;  %v742_v40 = vmul.f32 %v717_v37, %v694_v35 }
 0x2bf   : > { %968 = vperm.xlu0 %1291, %v938_v46   ;;  %v929_v45 = vsub.f32 2.0, %v921_v51  ;;  %1339 = vrcp.f32 %v910_v43 }
 0x2c0   : > { %v1334_v47 = vpop.eup %1333  ;;  %v722_v32 = vpop.permute.xlu1 %721 }
 0x2c1   : > { %v937_v48 = vmul.f32 %v1332_v21, %v929_v45  ;;  %v924_v52 = vmul.f32 %v1334_v47, %v908_v60  ;;  %v727_v29 = vpop.permute.xlu0 %726  ;;  %v743_v59 = vmul.f32 %v722_v32, %v695_v50 }
 0x2c2   : > { %v744_v53 = vmul.f32 %v727_v29, %v696_v49 }
 0x2c3   : > { %963 = vperm.xlu1 %1292, %v937_v48   ;;  %v932_v54 = vsub.f32 2.0, %v924_v52 }
 0x2c4   : > { %v1336_v55 = vpop.eup %1335  ;;  %v732_v6 = vpop.permute.xlu1 %731 }
 0x2c5   : > { %v940_v56 = vmul.f32 %v1334_v47, %v932_v54  ;;  %v923_v57 = vmul.f32 %v1336_v55, %v907_v13  ;;  %v737_v4 = vpop.permute.xlu0 %736  ;;  %v745_v36 = vmul.f32 %v732_v6, %v697_v38 }
 0x2c6   : > { %v746_v9 = vmul.f32 %v737_v4, %v698_v63 }
 0x2c7   : > { %978 = vperm.xlu0 %1291, %v940_v56   ;;  %v931_v61 = vsub.f32 2.0, %v923_v57 }
 0x2c8   : > { %v1338_v62 = vpop.eup %1337 }
 0x2c9   : > { %v939_v0 = vmul.f32 %v1336_v55, %v931_v61  ;;  %v925_v1 = vmul.f32 %v1338_v62, %v909_v19 }
 0x2cb   : > { %973 = vperm.xlu1 %1292, %v939_v0   ;;  %v933_v2 = vsub.f32 2.0, %v925_v1 }
 0x2cc   : > { %v1340_v3 = vpop.eup %1339 }
 0x2cd   : > { %v941_v7 = vmul.f32 %v1338_v62, %v933_v2  ;;  %v926_v8 = vmul.f32 %v1340_v3, %v910_v43 }
 0x2cf   : > { %983 = vperm.xlu1 %1292, %v941_v7   ;;  %v934_v12 = vsub.f32 2.0, %v926_v8 }
 0x2d1   : > { %v942_v23 = vmul.f32 %v1340_v3, %v934_v12 }
 0x2d2   : > { %v1254_v24 = vpop.f32.mrf.mxu1 }
 0x2d3   : > { %v877_v30 = vadd.f32 %v1254_v24, %v740_v22  ;;  %988 = vperm.xlu0 %1291, %v942_v23  }
 0x2d4   : > { %v837_v31 = vpop.f32.mrf.mxu1 }
 0x2d5   : > { %885 = vst.msk [vmem:[#allocation4 + $0x8] sm:$0xff] %vm310_vm0, %v877_v30  ;;  %v876_v34 = vadd.f32 %v837_v31, %v739_v27 }
 0x2d7   : > { %884 = vst.msk [vmem:[#allocation4] sm:$0xff] %vm310_vm0, %v876_v34 }
 0x2db   : > { %v1257_v41 = vpop.f32.mrf.mxu1 }
 0x2dc   : > { %v879_v42 = vadd.f32 %v1257_v41, %v742_v40  ;;  %v944_v46 = vld [vmem:[#allocation4 + $0x8] sm:$0xff] }
 0x2dd   : > { %v847_v28 = vpop.f32.mrf.mxu1 }
 0x2de   : > { %887 = vst.msk [vmem:[#allocation4 + $0x18] sm:$0xff] %vm310_vm0, %v879_v42  ;;  %v878_v44 = vadd.f32 %v847_v28, %v741_v25  ;;  %v943_v20 = vld [vmem:[#allocation4] sm:$0xff] }
 0x2e0   : > { %886 = vst.msk [vmem:[#allocation4 + $0x10] sm:$0xff] %vm310_vm0, %v878_v44 }
 0x2e3   : > { %v1260_v58 = vpop.f32.mrf.mxu1 }
 0x2e4   : > { %v881_v60 = vadd.f32 %v1260_v58, %v744_v53 }
 0x2e5   : > { %v857_v33 = vpop.f32.mrf.mxu1  ;;  %v946_v45 = vld [vmem:[#allocation4 + $0x18] sm:$0xff] }
 0x2e6   : > { %889 = vst.msk [vmem:[#allocation4 + $0x28] sm:$0xff] %vm310_vm0, %v881_v60  ;;  %v880_v5 = vadd.f32 %v857_v33, %v743_v59 }
 0x2e7   : > { %v945_v52 = vld [vmem:[#allocation4 + $0x10] sm:$0xff] }
 0x2e8   : > { %888 = vst.msk [vmem:[#allocation4 + $0x20] sm:$0xff] %vm310_vm0, %v880_v5 }
 0x2ea   : > { %v1263_v13 = vpop.f32.mrf.mxu1 }
 0x2eb   : > { %v883_v14 = vadd.f32 %v1263_v13, %v746_v9 }
 0x2ec   : > { %v867_v16 = vpop.f32.mrf.mxu1 }
 0x2ed   : > { %891 = vst.msk [vmem:[#allocation4 + $0x38] sm:$0xff] %vm310_vm0, %v883_v14  ;;  %v882_v18 = vadd.f32 %v867_v16, %v745_v36  ;;  %v948_v56 = vld [vmem:[#allocation4 + $0x28] sm:$0xff] }
 0x2ef   : > { %890 = vst.msk [vmem:[#allocation4 + $0x30] sm:$0xff] %vm310_vm0, %v882_v18  ;;  %v947_v62 = vld [vmem:[#allocation4 + $0x20] sm:$0xff] }
 0x2f4   : > { %v950_v8 = vld [vmem:[#allocation4 + $0x38] sm:$0xff] }
 0x2f6   : > { %v949_v2 = vld [vmem:[#allocation4 + $0x30] sm:$0xff] }
 0x332   : > { %v954_v19 = vpop.permute.xlu1 %953 }
 0x333   : > { %v991_v21 = vmul.f32 %v954_v19, %v943_v20 }
 0x335   : > { %999 = vst.msk [vmem:[%s1668_s28] sm:$0xff] %vm310_vm0, %v991_v21 }
 0x336   : > { %v959_v51 = vpop.permute.xlu0 %958 }
 0x337   : > { %v992_v43 = vmul.f32 %v959_v51, %v944_v46 }
 0x339   : > { %1000 = vst.msk [vmem:[%s1668_s28 + $0x8] sm:$0xff] %vm310_vm0, %v992_v43 }
 0x33a   : > { %v969_v47 = vpop.permute.xlu0 %968 }
 0x33b   : > { %v994_v48 = vmul.f32 %v969_v47, %v946_v45 }
 0x33d   : > { %1002 = vst.msk [vmem:[%s1668_s28 + $0x18] sm:$0xff] %vm310_vm0, %v994_v48 }
 0x33e   : > { %v964_v54 = vpop.permute.xlu1 %963 }
 0x33f   : > { %v993_v55 = vmul.f32 %v964_v54, %v945_v52 }
 0x341   : > { %1001 = vst.msk [vmem:[%s1668_s28 + $0x10] sm:$0xff] %vm310_vm0, %v993_v55 }
 0x342   : > { %v979_v57 = vpop.permute.xlu0 %978 }
 0x343   : > { %v996_v61 = vmul.f32 %v979_v57, %v948_v56 }
 0x345   : > { %1004 = vst.msk [vmem:[%s1668_s28 + $0x28] sm:$0xff] %vm310_vm0, %v996_v61 }
 0x346   : > { %v974_v0 = vpop.permute.xlu1 %973 }
 0x347   : > { %v995_v1 = vmul.f32 %v974_v0, %v947_v62 }
 0x349   : > { %1003 = vst.msk [vmem:[%s1668_s28 + $0x20] sm:$0xff] %vm310_vm0, %v995_v1 }
 0x34a   : > { %v984_v3 = vpop.permute.xlu1 %983 }
 0x34b   : > { %v997_v7 = vmul.f32 %v984_v3, %v949_v2 }
 0x34d   : > { %1005 = vst.msk [vmem:[%s1668_s28 + $0x30] sm:$0xff] %vm310_vm0, %v997_v7 }
 0x34e   : > { %v989_v10 = vpop.permute.xlu0 %988 }
 0x34f   : > { %v998_v11 = vmul.f32 %v989_v10, %v950_v8 }
 0x351   : > { %1006 = vst.msk [vmem:[%s1668_s28 + $0x38] sm:$0xff] %vm310_vm0, %v998_v11 }
 0x352 PF: > { %s13_s14 = sadd.s32 1, %s1363_s14   ;;  %s1699_s12 = smov %s1359_s13 }
 0x353   : > { %p10_p5 = scmp.ge.s32.totalorder %s13_s14, 4   ;;  %s1700_s13 = smov %s1702_s15 }
 0x355   :  { %12 = sbr.rel (!%p10_p5) target bundleno = 2 (0x2), region = 76 }

</bundles_post_ra>
